<compile_context>
chip_gen: v7x
topology: tpu7x:2x2x1
jax: 0.10.0
libtpu: 0.0.40
codegen_flags: <defaults>
</compile_context>

<pallas_src>
import functools

import jax
import jax.numpy as jnp
from jax.experimental import pallas as pl
from jax.experimental.pallas import tpu as pltpu


_LANE = 128
_SUB = 8
_MXU_MIN_K = 32   # below this contraction size the 1x1 conv runs on the VPU


# ----------------------------- hardware info ------------------------------- #

@functools.lru_cache(maxsize=None)
def _phys_vmem_bytes():
    """Physical VMEM of the attached TPU generation (conservative default)."""
    try:
        v = int(getattr(pltpu.get_tpu_info(), "vmem_capacity_bytes", 0))
        if v > 0:
            return v
    except Exception:
        pass
    return 64 << 20   # v7x-sized fallback (smallest of the supported chips)


def _vmem_budget():
    # budget for (double-buffered) pipeline blocks; leave headroom for the
    # compiler's internal scratch.  v5e/v6e: ~104 MiB, v7x: ~40 MiB.
    phys = _phys_vmem_bytes()
    return max(24 << 20, phys - (24 << 20))


def _compiler_params(block_bytes, semantics):
    phys = _phys_vmem_bytes()
    hi = max(16 << 20, phys - (16 << 20))
    vmem = int(min(max(2 * block_bytes + (8 << 20), 16 << 20), hi))
    return pltpu.CompilerParams(dimension_semantics=semantics,
                                vmem_limit_bytes=vmem)


# ----------------------------- tile selection ------------------------------ #

def _pick_add_tile(r, l, budget):
    """(tr, tl) for the flattened (N*C, L) elementwise add."""
    per_elem = 3 * 2 * 4                 # in+in+out, double-buffered, f32
    if r * l * per_elem <= budget:
        return r, l                      # whole problem in one block
    if l * per_elem * _SUB <= budget:
        tl = l
    else:
        tl = max(_LANE, (budget // (per_elem * _SUB)) // _LANE * _LANE)
    tr_cap = max(_SUB, budget // (per_elem * tl))
    tr = r if r <= tr_cap else max(_SUB, min(tr_cap, r) // _SUB * _SUB)
    return tr, tl


def _pick_l_tile(l, c_total, budget):
    """Lane tile for the L-tiled conv paths: full L if it fits, else big x128."""
    per_lane = 2 * c_total * 4           # double-buffered f32 columns
    if l * per_lane <= budget:
        return l
    return max(_LANE, (budget // per_lane) // _LANE * _LANE)


def _pick_ln_co_tile(co, ci, l, budget):
    """Output-channel tile for full-L LayerNorm; None -> use the L-split path."""
    per_row = (6 * l + 2 * ci) * 4       # src/out blocks (dbl-buf) + f32 temps + w row
    fixed = 2 * ci * l * 4               # resident attn block (dbl-buf)
    avail = budget - fixed
    if avail < per_row * min(co, _SUB):
        return None
    cap = avail // per_row
    if co <= cap:
        return co
    return max(_SUB, min(cap, co) // _SUB * _SUB)


def _pick_ln_split_tiles(co, ci, l, budget, max_tl):
    """(tco, tl) for the L-tiled LayerNorm fallback."""
    tl = l if l <= max_tl else max(_LANE, (max_tl // _LANE) * _LANE)
    per_row = (4 * tl + 2 * ci + 4) * 4  # src + x blocks (dbl-buf) + w row + stats
    fixed = 2 * ci * tl * 4              # resident attn block (dbl-buf)
    cap = max(min(co, _SUB), (budget - fixed) // per_row)
    tco = co if co <= cap else max(_SUB, min(cap, co) // _SUB * _SUB)
    return tco, tl


def _lane_spec(c, tl):
    # (N, C, L) -> per-step 2-D (C, TL) tile; batch dim squeezed away.
    return pl.BlockSpec((pl.Squeezed(), c, tl), lambda b, j: (b, 0, j))


# ----------------------------- compute helpers ----------------------------- #

def _conv1x1(w, x, use_mxu):
    """W[Co,Ci] @ x[Ci,TL] -> f32 (Co, TL).

    use_mxu is a trace-time bool: large Ci goes to the MXU; tiny Ci uses an
    unrolled VPU broadcast-FMA (an MXU matmul with Ci=Co=4 is >97% padding).
    """
    if use_mxu:
        return jnp.dot(w, x, preferred_element_type=jnp.float32)
    wf = w.astype(jnp.float32)
    xf = x.astype(jnp.float32)
    ci = wf.shape[1]
    acc = wf[:, 0:1] * xf[0:1, :]
    for c in range(1, ci):
        acc = acc + wf[:, c:c + 1] * xf[c:c + 1, :]
    return acc


# ------------------------------- kernels ----------------------------------- #

def _add_kernel(src_ref, attn_ref, out_ref):
    # out = src + attn  (HBM-roofline elementwise on a dense (TR, TL) tile)
    out_ref[...] = src_ref[...] + attn_ref[...]


def _add_linear_kernel(w_ref, src_ref, attn_ref, out_ref, *, use_mxu):
    # out = src + conv1x1(attn)
    y = _conv1x1(w_ref[...], attn_ref[...], use_mxu)
    out_ref[...] = (src_ref[...].astype(jnp.float32) + y).astype(out_ref.dtype)


def _linear_linear_kernel(ws_ref, wa_ref, src_ref, attn_ref, out_ref,
                          *, use_mxu_s, use_mxu_a):
    # out = conv1x1_s(src) + conv1x1_a(attn): two dots into one f32 accumulator
    # (no in-kernel concatenate / VMEM copy).
    acc = _conv1x1(ws_ref[...], src_ref[...], use_mxu_s)
    acc = acc + _conv1x1(wa_ref[...], attn_ref[...], use_mxu_a)
    out_ref[...] = acc.astype(out_ref.dtype)


def _ln_add_linear_kernel(w_ref, gamma_ref, beta_ref, src_ref, attn_ref,
                          out_ref, *, eps, inv_l, use_mxu):
    # out = LayerNormND(src + dropout(conv1x1(attn)))
    # TODO(synk): nn.Dropout() is identity in eval mode; training-mode p=0.5
    # Bernoulli masking is intentionally omitted.
    y = _conv1x1(w_ref[...], attn_ref[...], use_mxu)            # (TCo, L) f32
    x = src_ref[...].astype(jnp.float32) + y
    # two-pass stats (subtract mean first) -> matches torch, no cancellation
    mean = jnp.sum(x, axis=1, keepdims=True) * inv_l
    xc = x - mean
    var = jnp.sum(xc * xc, axis=1, keepdims=True) * inv_l
    inv_std = jax.lax.rsqrt(var + eps)                          # EUP, O(TCo)
    out = (gamma_ref[...].astype(jnp.float32) * (xc * inv_std)
           + beta_ref[...].astype(jnp.float32))
    out_ref[...] = out.astype(out_ref.dtype)


def _ln_stats_kernel(w_ref, src_ref, attn_ref, x_ref, sum_ref, sumsq_ref,
                     *, l_total, use_mxu, need_mask):
    # Fallback pass 1 (L-tiled): x = src + conv1x1(attn), accumulate sum/sumsq
    # over the (innermost, 'arbitrary') lane-grid axis.
    li = pl.program_id(2)
    y = _conv1x1(w_ref[...], attn_ref[...], use_mxu)            # (TCo, TL)
    x = src_ref[...].astype(jnp.float32) + y
    x_ref[...] = x
    if need_mask:
        tl = x.shape[1]
        lane = jax.lax.broadcasted_iota(jnp.int32, x.shape, 1)
        x = jnp.where(li * tl + lane < l_total, x, 0.0)

    @pl.when(li == 0)
    def _():
        sum_ref[...] = jnp.zeros_like(sum_ref)
        sumsq_ref[...] = jnp.zeros_like(sumsq_ref)

    sum_ref[...] = sum_ref[...] + jnp.sum(x, axis=1, keepdims=True)
    sumsq_ref[...] = sumsq_ref[...] + jnp.sum(x * x, axis=1, keepdims=True)


def _ln_norm_kernel(gamma_ref, beta_ref, sum_ref, sumsq_ref, x_ref, out_ref,
                    *, eps, inv_l):
    # Fallback pass 2 (L-tiled): normalize with the full-L statistics.
    # TODO(synk): single-pass var = E[x^2]-E[x]^2 here (fallback only); a
    # shifted/Welford accumulation would be more robust for |mean| >> std.
    x = x_ref[...]
    mean = sum_ref[...] * inv_l
    var = jnp.maximum(sumsq_ref[...] * inv_l - mean * mean, 0.0)
    inv_std = jax.lax.rsqrt(var + eps)
    out = (gamma_ref[...].astype(jnp.float32) * ((x - mean) * inv_std)
           + beta_ref[...].astype(jnp.float32))
    out_ref[...] = out.astype(out_ref.dtype)


# --------------------------- pallas wrappers ------------------------------- #

def _call_add(src, attn):
    n, c, l = src.shape
    r = n * c
    s2 = src.reshape(r, l)
    a2 = attn.reshape(r, l)
    tr, tl = _pick_add_tile(r, l, _vmem_budget())
    spec = pl.BlockSpec((tr, tl), lambda i, j: (i, j))
    block_bytes = 3 * tr * tl * 4
    out2 = pl.pallas_call(
        _add_kernel,
        out_shape=jax.ShapeDtypeStruct((r, l), src.dtype),
        grid=(pl.cdiv(r, tr), pl.cdiv(l, tl)),
        in_specs=[spec, spec],
        out_specs=spec,
        compiler_params=_compiler_params(block_bytes, ("parallel", "parallel")),
    )(s2, a2)
    return out2.reshape(n, c, l)


def _call_add_linear(src, attn, w):
    n, cs, l = src.shape
    co, ci = w.shape
    budget = _vmem_budget()
    use_mxu = ci >= _MXU_MIN_K
    c_total = cs + ci + 2 * co              # blocks + f32 conv temp
    tl = _pick_l_tile(l, c_total, budget)
    if (not use_mxu) and ci > 8:
        tl = min(tl, 512)                   # keep unrolled VPU FMA in-vreg
    kernel = functools.partial(_add_linear_kernel, use_mxu=use_mxu)
    block_bytes = (c_total * tl + co * ci) * 4
    return pl.pallas_call(
        kernel,
        out_shape=jax.ShapeDtypeStruct((n, co, l), src.dtype),
        grid=(n, pl.cdiv(l, tl)),
        in_specs=[pl.BlockSpec((co, ci), lambda b, j: (0, 0)),
                  _lane_spec(cs, tl), _lane_spec(ci, tl)],
        out_specs=_lane_spec(co, tl),
        compiler_params=_compiler_params(block_bytes, ("parallel", "parallel")),
    )(w, src, attn)


def _call_linear_linear(src, attn, ws, wa):
    n, cs, l = src.shape
    ca = attn.shape[1]
    co = ws.shape[0]
    budget = _vmem_budget()
    use_mxu_s = cs >= _MXU_MIN_K
    use_mxu_a = ca >= _MXU_MIN_K
    c_total = cs + ca + 2 * co
    tl = _pick_l_tile(l, c_total, budget)
    if ((not use_mxu_s) and cs > 8) or ((not use_mxu_a) and ca > 8):
        tl = min(tl, 512)
    kernel = functools.partial(_linear_linear_kernel,
                               use_mxu_s=use_mxu_s, use_mxu_a=use_mxu_a)
    block_bytes = (c_total * tl + co * (cs + ca)) * 4
    return pl.pallas_call(
        kernel,
        out_shape=jax.ShapeDtypeStruct((n, co, l), src.dtype),
        grid=(n, pl.cdiv(l, tl)),
        in_specs=[pl.BlockSpec((co, cs), lambda b, j: (0, 0)),
                  pl.BlockSpec((co, ca), lambda b, j: (0, 0)),
                  _lane_spec(cs, tl), _lane_spec(ca, tl)],
        out_specs=_lane_spec(co, tl),
        compiler_params=_compiler_params(block_bytes, ("parallel", "parallel")),
    )(ws, wa, src, attn)


def _call_ln_add_linear(src, attn, w, gamma, beta, eps,
                        force_split=False, split_max_tl=2048):
    n, cs, l = src.shape
    co, ci = w.shape
    budget = _vmem_budget()
    use_mxu = ci >= _MXU_MIN_K

    tco = None if force_split else _pick_ln_co_tile(co, ci, l, budget)
    if tco is None:
        return _call_ln_add_linear_split(src, attn, w, gamma, beta, eps,
                                         use_mxu=use_mxu, budget=budget,
                                         max_tl=split_max_tl)

    # Primary path: full-L blocks, Co tiled so the footprint fits VMEM.
    kernel = functools.partial(_ln_add_linear_kernel, eps=eps,
                               inv_l=1.0 / float(l), use_mxu=use_mxu)
    block_bytes = (4 * tco * l + ci * l + tco * ci) * 4
    return pl.pallas_call(
        kernel,
        out_shape=jax.ShapeDtypeStruct((n, co, l), src.dtype),
        grid=(n, pl.cdiv(co, tco)),
        in_specs=[
            pl.BlockSpec((tco, ci), lambda b, c: (c, 0)),
            pl.BlockSpec((tco, 1), lambda b, c: (c, 0)),
            pl.BlockSpec((tco, 1), lambda b, c: (c, 0)),
            pl.BlockSpec((pl.Squeezed(), tco, l), lambda b, c: (b, c, 0)),
            pl.BlockSpec((pl.Squeezed(), ci, l), lambda b, c: (b, 0, 0)),
        ],
        out_specs=pl.BlockSpec((pl.Squeezed(), tco, l), lambda b, c: (b, c, 0)),
        compiler_params=_compiler_params(block_bytes, ("parallel", "parallel")),
    )(w, gamma, beta, src, attn)


def _call_ln_add_linear_split(src, attn, w, gamma, beta, eps, *, use_mxu,
                              budget, max_tl):
    """L-tiled LayerNorm fallback: bounded VMEM even for huge L (v7x-safe)."""
    n, cs, l = src.shape
    co, ci = w.shape
    tco, tl = _pick_ln_split_tiles(co, ci, l, budget, max_tl)
    n_l = pl.cdiv(l, tl)
    need_mask = (l % tl) != 0

    # pass 1: materialize x = src + conv1x1(attn) and per-row sum / sum-of-sq
    stats_kernel = functools.partial(_ln_stats_kernel, l_total=l,
                                     use_mxu=use_mxu, need_mask=need_mask)
    block_a = (3 * tco * tl + ci * tl + tco * ci + 2 * tco) * 4
    x_f32, s, ss = pl.pallas_call(
        stats_kernel,
        out_shape=(jax.ShapeDtypeStruct((n, co, l), jnp.float32),
                   jax.ShapeDtypeStruct((n, co, 1), jnp.float32),
                   jax.ShapeDtypeStruct((n, co, 1), jnp.float32)),
        grid=(n, pl.cdiv(co, tco), n_l),
        in_specs=[
            pl.BlockSpec((tco, ci), lambda b, c, j: (c, 0)),
            pl.BlockSpec((pl.Squeezed(), tco, tl), lambda b, c, j: (b, c, j)),
            pl.BlockSpec((pl.Squeezed(), ci, tl), lambda b, c, j: (b, 0, j)),
        ],
        out_specs=(
            pl.BlockSpec((pl.Squeezed(), tco, tl), lambda b, c, j: (b, c, j)),
            pl.BlockSpec((pl.Squeezed(), tco, 1), lambda b, c, j: (b, c, 0)),
            pl.BlockSpec((pl.Squeezed(), tco, 1), lambda b, c, j: (b, c, 0)),
        ),
        compiler_params=_compiler_params(
            block_a, ("parallel", "parallel", "arbitrary")),
    )(w, src, attn)

    # pass 2: normalize with the full-L statistics
    norm_kernel = functools.partial(_ln_norm_kernel, eps=eps,
                                    inv_l=1.0 / float(l))
    block_b = (3 * tco * tl + 4 * tco) * 4
    return pl.pallas_call(
        norm_kernel,
        out_shape=jax.ShapeDtypeStruct((n, co, l), src.dtype),
        grid=(n, pl.cdiv(co, tco), n_l),
        in_specs=[
            pl.BlockSpec((tco, 1), lambda b, c, j: (c, 0)),
            pl.BlockSpec((tco, 1), lambda b, c, j: (c, 0)),
            pl.BlockSpec((pl.Squeezed(), tco, 1), lambda b, c, j: (b, c, 0)),
            pl.BlockSpec((pl.Squeezed(), tco, 1), lambda b, c, j: (b, c, 0)),
            pl.BlockSpec((pl.Squeezed(), tco, tl), lambda b, c, j: (b, c, j)),
        ],
        out_specs=pl.BlockSpec((pl.Squeezed(), tco, tl),
                               lambda b, c, j: (b, c, j)),
        compiler_params=_compiler_params(
            block_b, ("parallel", "parallel", "parallel")),
    )(gamma, beta, s, ss, x_f32)


# --------------------------- module equivalent ----------------------------- #

def _init_linear(key, fan_out, fan_in, dtype):
    # deterministic kaiming-uniform-like init, shape (out, in), bias-free
    bound = 1.0 / jnp.sqrt(jnp.asarray(fan_in, jnp.float32))
    return jax.random.uniform(key, (fan_out, fan_in), dtype,
                              minval=-bound, maxval=bound)


class PostAttentionCombinerPallas:
    """JAX/Pallas port of PostAttentionCombiner (forward only)."""

    def __init__(self, ndim, features_src, features_attn=None,
                 features_out=None, method='add', *, key=None,
                 eps=1e-12, dtype=jnp.float32):
        features_attn = features_attn or features_src
        # NOTE: mirrors the torch code; an explicit features_out is ignored
        # whenever features_attn is set.
        features_out = features_attn or features_out
        self.ndim = ndim
        self.features_src = features_src
        self.features_attn = features_attn
        self.features_out = features_out
        self.method = method
        self.eps = eps
        if key is None:
            key = jax.random.PRNGKey(0)
        k1, k2 = jax.random.split(key)

        if method == 'add':
            assert features_src == features_attn == features_out
        elif method == 'add-linear':
            assert features_src == features_out
            self.attn_w = _init_linear(k1, features_out, features_attn, dtype)
        elif method == 'ln-add-linear-do':
            assert features_src == features_out
            self.attn_w = _init_linear(k1, features_out, features_attn, dtype)
            self.ln_gamma = jnp.ones((features_out, 1), dtype)
            self.ln_beta = jnp.zeros((features_out, 1), dtype)
        elif method == 'linear-linear':
            self.src_w = _init_linear(k1, features_out, features_src, dtype)
            self.attn_w = _init_linear(k2, features_out, features_attn, dtype)
        elif method == 'concatenate':
            self.features_out = features_src + features_attn
        else:
            raise ValueError('unknown combine function %s' % str(method))

    def __call__(self, src, attn):
        if self.method == 'concatenate':
            # pure data movement (torch.cat along channel dim) -> JAX glue
            return jnp.concatenate([src, attn], axis=1)

        n = src.shape[0]
        spatial = src.shape[2:]
        src3 = src.reshape(n, src.shape[1], -1)     # (N, C, L)
        attn3 = attn.reshape(n, attn.shape[1], -1)  # (N, C, L)

        if self.method == 'add':
            out3 = _call_add(src3, attn3)
        elif self.method == 'add-linear':
            out3 = _call_add_linear(src3, attn3, self.attn_w)
        elif self.method == 'ln-add-linear-do':
            out3 = _call_ln_add_linear(src3, attn3, self.attn_w,
                                       self.ln_gamma, self.ln_beta, self.eps)
        elif self.method == 'linear-linear':
            out3 = _call_linear_linear(src3, attn3, self.src_w, self.attn_w)
        else:
            raise ValueError('unknown combine function %s' % str(self.method))

        return out3.reshape((n, self.features_out) + spatial)


# ---------------------------- pure-JAX reference ---------------------------- #

def _ref_forward(combiner, src, attn):
    m = combiner.method
    if m == 'add':
        return src + attn
    if m == 'concatenate':
        return jnp.concatenate([src, attn], axis=1)
    n = src.shape[0]
    spatial = src.shape[2:]
    s3 = src.reshape(n, src.shape[1], -1)
    a3 = attn.reshape(n, attn.shape[1], -1)
    hp = jax.lax.Precision.HIGHEST
    if m == 'add-linear':
        o = s3 + jnp.einsum('oc,ncl->nol', combiner.attn_w, a3, precision=hp)
    elif m == 'linear-linear':
        o = (jnp.einsum('oc,ncl->nol', combiner.src_w, s3, precision=hp)
             + jnp.einsum('oc,ncl->nol', combiner.attn_w, a3, precision=hp))
    elif m == 'ln-add-linear-do':
        x = s3 + jnp.einsum('oc,ncl->nol', combiner.attn_w, a3, precision=hp)
        u = jnp.mean(x, axis=2, keepdims=True)
        v = jnp.mean((x - u) ** 2, axis=2, keepdims=True)
        xn = (x - u) / jnp.sqrt(v + combiner.eps)
        o = combiner.ln_gamma[None] * xn + combiner.ln_beta[None]
    else:
        raise ValueError(m)
    return o.reshape((n, combiner.features_out) + spatial)


# --------------------------------- main ------------------------------------ #

def _check(name, out, ref, atol, rtol):
    ok = bool(jnp.allclose(out, ref, atol=atol, rtol=rtol))
    if not ok:
        err = float(jnp.max(jnp.abs(out - ref)))
        print(f"MISMATCH {name}: max_abs_err={err}")
    return ok


if __name__ == "__main__":
    key = jax.random.PRNGKey(0)
    k_src, k_attn, k_params = jax.random.split(key, 3)
    ok = True

    # 4-D NCHW, tiny channels (VPU 1x1-conv path)
    N, C, H, W = 2, 4, 16, 16
    src = jax.random.normal(k_src, (N, C, H, W), jnp.float32)
    attn = jax.random.normal(k_attn, (N, C, H, W), jnp.float32)
    for method in ('add', 'add-linear', 'ln-add-linear-do',
                   'linear-linear', 'concatenate'):
        comb = PostAttentionCombinerPallas(
            ndim=4, features_src=C, method=method, key=k_params)
        out = comb(src, attn)
        jax.block_until_ready(out)
        ok &= _check(f"{method}/C={C}", out, _ref_forward(comb, src, attn),
                     1e-4, 1e-4)

    # forced L-split LayerNorm fallback (lane-grid accumulators, 2 L-tiles)
    comb = PostAttentionCombinerPallas(
        ndim=4, features_src=C, method='ln-add-linear-do', key=k_params)
    s3, a3 = src.reshape(N, C, -1), attn.reshape(N, C, -1)
    out = _call_ln_add_linear(s3, a3, comb.attn_w, comb.ln_gamma, comb.ln_beta,
                              comb.eps, force_split=True, split_max_tl=128)
    jax.block_until_ready(out)
    ok &= _check("ln-split/4d", out.reshape(N, C, H, W),
                 _ref_forward(comb, src, attn), 1e-4, 1e-4)

    # 3-D (Conv1d) with L not a multiple of 128: masked stats in the split path
    L3 = 300
    src1 = jax.random.normal(k_src, (1, C, L3), jnp.float32)
    attn1 = jax.random.normal(k_attn, (1, C, L3), jnp.float32)
    comb1 = PostAttentionCombinerPallas(
        ndim=3, features_src=C, method='ln-add-linear-do', key=k_params)
    out = comb1(src1, attn1)
    jax.block_until_ready(out)
    ok &= _check("ln/3d", out, _ref_forward(comb1, src1, attn1), 1e-4, 1e-4)
    out = _call_ln_add_linear(src1, attn1, comb1.attn_w, comb1.ln_gamma,
                              comb1.ln_beta, comb1.eps,
                              force_split=True, split_max_tl=128)
    jax.block_until_ready(out)
    ok &= _check("ln-split/3d", out, _ref_forward(comb1, src1, attn1),
                 1e-4, 1e-4)

    # larger channel count -> MXU 1x1-conv branch (looser tolerance: the MXU
    # pass count for f32 may differ from the XLA reference matmul)
    C2 = 64
    src2 = jax.random.normal(k_src, (N, C2, H, W), jnp.float32)
    attn2 = jax.random.normal(k_attn, (N, C2, H, W), jnp.float32)
    for method in ('add-linear', 'linear-linear', 'ln-add-linear-do'):
        comb = PostAttentionCombinerPallas(
            ndim=4, features_src=C2, method=method, key=k_params)
        out = comb(src2, attn2)
        jax.block_until_ready(out)
        ok &= _check(f"{method}/C={C2}", out, _ref_forward(comb, src2, attn2),
                     1e-2, 1e-2)

    if ok:
        print("KERNEL_OK")
</pallas_src>

<mosaic_0001>
module attributes {stable_mosaic.version = 11 : i64} {
  func.func @_add_kernel(%arg0: i32, %arg1: i32, %arg2: memref<8x256xf32, #tpu.memory_space<vmem>>, %arg3: memref<8x256xf32, #tpu.memory_space<vmem>>, %arg4: memref<8x256xf32, #tpu.memory_space<vmem>>) attributes {dimension_semantics = [#tpu.dimension_semantics<parallel>, #tpu.dimension_semantics<parallel>], iteration_bounds = array<i64: 1, 1>, scalar_prefetch = 0 : i64, scratch_operands = 0 : i64, tpu.core_type = #tpu.core_type<tc>, window_params = [{transform_indices = @transform_0, window_bounds = array<i64: 8, 256>}, {transform_indices = @transform_1, window_bounds = array<i64: 8, 256>}, {transform_indices = @transform_2, window_bounds = array<i64: 8, 256>}]} {
    %c0 = arith.constant 0 : index
    %c0_0 = arith.constant 0 : index
    %0 = vector.load %arg2[%c0, %c0_0] : memref<8x256xf32, #tpu.memory_space<vmem>>, vector<8x256xf32>
    %c0_1 = arith.constant 0 : index
    %c0_2 = arith.constant 0 : index
    %1 = vector.load %arg3[%c0_1, %c0_2] : memref<8x256xf32, #tpu.memory_space<vmem>>, vector<8x256xf32>
    %2 = arith.addf %0, %1 : vector<8x256xf32>
    %c0_3 = arith.constant 0 : index
    %c0_4 = arith.constant 0 : index
    %3 = vector.load %arg4[%c0_3, %c0_4] : memref<8x256xf32, #tpu.memory_space<vmem>>, vector<8x256xf32>
    tpu.vector_store %arg4[%c0_3, %c0_4], %2 {strides = array<i32>} : memref<8x256xf32, #tpu.memory_space<vmem>>, vector<8x256xf32>,
    return
  }
  func.func @transform_0(%arg0: i32, %arg1: i32) -> (i32, i32) {
    %c0_i32 = arith.constant 0 : i32
    return %arg0, %arg1 : i32, i32
  }
  func.func @transform_1(%arg0: i32, %arg1: i32) -> (i32, i32) {
    %c0_i32 = arith.constant 0 : i32
    return %arg0, %arg1 : i32, i32
  }
  func.func @transform_2(%arg0: i32, %arg1: i32) -> (i32, i32) {
    %c0_i32 = arith.constant 0 : i32
    return %arg0, %arg1 : i32, i32
  }
}

</mosaic_0001>

<bundles_post_ra>
// kernel: tpu_custom_call.1
= control target key start
LH: loop header
LB: loop body
LE: loop exit
PB: predicated region body
PF: predicated region fallthrough
CT: control target
= control target key end

     0   :  { %7 = vsyncpa [#allocation3], 0  ;;  %s189_s0 = inlined_call_operand.hbm [shape: f32[8,256], index: 0, kind: input, shape index: {}]   ;;  %s190_s1 = inlined_call_operand.hbm [shape: f32[8,256], index: 1, kind: input, shape index: {}]   ;;  %s191_s2 = inlined_call_operand.hbm [shape: f32[8,256], index: 2, kind: output, shape index: {}]  }
   0x1   :  { %8 = vsyncpa [#allocation6], 0 }
   0x2   :  { %9 = vsyncpa [#allocation4], 0  ;;  %s135_s9 = smov [#allocation2]   ;;  %s136_s11 = smov [#allocation5]  }
   0x3   :  { %s16_s10 = sshll.u32 %s135_s9, 4  ;;  %s26_s12 = sshll.u32 %s136_s11, 4  ;;  %s17_s10 = int_to_ptr.vmem [resolvable:$true] %s16_s10  ;;  %s27_s12 = int_to_ptr.vmem [resolvable:$true] %s26_s12 }
   0x4   :  { %s63_s15 = scalar_lea.hbm %s189_s0, 256 }
   0x5   :  { %p64_p0 = scmp.ne.s32.totalorder %s189_s0, %s63_s15  ;;  %p67_p1 = scmp.lt.u32.totalorder %s63_s15, %s189_s0 }
   0x7   :  { %p69_p2 = pnand %p67_p1, %p64_p0 }
   0x9   :  { %72 = shalt.err (!%p69_p2)
}
   0xa   :  { %s73_s20 = scalar_lea.vmem %s17_s10, 256  ;;  %p78_p4 = scmp.lt.s32.totalorder %s17_s10, %s17_s10 }
   0xb   :  { %p74_p3 = scmp.ne.s32.totalorder %s17_s10, %s73_s20  ;;  %p79_p5 = scmp.lt.s32.totalorder %s73_s20, %s73_s20 }
   0xd   :  { %p80_p6 = por %p79_p5, %p78_p4 }
   0xf   :  { %p81_p7 = pnand %p80_p6, %p74_p3 }
  0x11   :  { %84 = shalt.err (!%p81_p7)
}
  0x12   :  { %19 = dma.hbm_to_vmem [thread:$0]  %s189_s0, 256, %s17_s10, [#allocation3]  }
  0x13   :  { %s85_s25 = scalar_lea.hbm %s190_s1, 256 }
  0x14   :  { %p86_p8 = scmp.ne.s32.totalorder %s190_s1, %s85_s25  ;;  %p89_p9 = scmp.lt.u32.totalorder %s85_s25, %s190_s1 }
  0x16   :  { %p91_p10 = pnand %p89_p9, %p86_p8 }
  0x18   :  { %94 = shalt.err (!%p91_p10)
}
  0x19   :  { %s95_s30 = scalar_lea.vmem %s27_s12, 256  ;;  %p100_p12 = scmp.lt.s32.totalorder %s27_s12, %s27_s12 }
  0x1a   :  { %p96_p11 = scmp.ne.s32.totalorder %s27_s12, %s95_s30  ;;  %p101_p13 = scmp.lt.s32.totalorder %s95_s30, %s95_s30 }
  0x1c   :  { %p102_p0 = por %p101_p13, %p100_p12 }
  0x1e   :  { %p103_p1 = pnand %p102_p0, %p96_p11 }
  0x20   :  { %106 = shalt.err (!%p103_p1)
}
  0x21   :  { %29 = dma.hbm_to_vmem [thread:$0]  %s190_s1, 256, %s27_s12, [#allocation6]  }
  0x22   :  { %129 = dma.done.wait [#allocation3], 256  }
  0x23   :  { %130 = vsyncadd [#allocation3], 4294967040 }
  0x24   :  { %131 = dma.done.wait [#allocation6], 256  }
  0x25   :  { %132 = vsyncadd [#allocation6], 4294967040  ;;  %s137_s4 = smov [#allocation7]   ;;  %v36_v0 = vld [vmem:[#allocation2] sm:$0xff]  ;;  %v38_v1 = vld [vmem:[#allocation5] sm:$0xff] }
  0x26   :  { %s50_s5 = sshll.u32 %s137_s4, 4  ;;  %v37_v2 = vld [vmem:[#allocation2 + $0x8] sm:$0xff]  ;;  %v40_v3 = vadd.f32 %v38_v1, %v36_v0  ;;  %v39_v4 = vld [vmem:[#allocation5 + $0x8] sm:$0xff]  ;;  %s51_s5 = int_to_ptr.vmem [resolvable:$true] %s50_s5 }
  0x27   :  { %v41_v5 = vadd.f32 %v39_v4, %v37_v2  ;;  %s107_s6 = scalar_lea.vmem %s51_s5, 256  ;;  %p112_p3 = scmp.lt.s32.totalorder %s51_s5, %s51_s5 }
  0x28   :  { %42 = vst [vmem:[#allocation7] sm:$0xff] %v40_v3  ;;  %p108_p2 = scmp.ne.s32.totalorder %s51_s5, %s107_s6  ;;  %p113_p4 = scmp.lt.s32.totalorder %s107_s6, %s107_s6 }
  0x29   :  { %43 = vst [vmem:[#allocation7 + $0x8] sm:$0xff] %v41_v5 }
  0x2a   :  { %p114_p5 = por %p113_p4, %p112_p3 }
  0x2c   :  { %p115_p6 = pnand %p114_p5, %p108_p2 }
  0x2e   :  { %118 = shalt.err (!%p115_p6)
}
  0x2f   :  { %s119_s8 = scalar_lea.hbm %s191_s2, 256 }
  0x30   :  { %p120_p7 = scmp.ne.s32.totalorder %s191_s2, %s119_s8  ;;  %p123_p8 = scmp.lt.u32.totalorder %s119_s8, %s191_s2 }
  0x32   :  { %p125_p9 = pnand %p123_p8, %p120_p7 }
  0x34   :  { %128 = shalt.err (!%p125_p9)
}
  0x35   :  { %53 = dma.vmem_to_hbm [thread:$0]  %s51_s5, 256, %s191_s2, [#allocation4]  }
  0x36   :  { %133 = dma.done.wait [#allocation4], 256  }
  0x37   :  { %134 = vsyncadd [#allocation4], 4294967040 }
  0x38   :  { %57 = vsyncpa [#allocation3], 1 }
  0x39   :  { %58 = vsyncpa [#allocation6], 1 }
  0x3a   :  { %59 = vsyncpa [#allocation4], 1 }

</bundles_post_ra>
